<compile_context>
chip_gen: v6e
topology: v6e:2x2x1
jax: 0.10.0
libtpu: 0.0.40
codegen_flags: <defaults>
</compile_context>

<pallas_src>
import numpy as np
import jax
import jax.numpy as jnp
from jax.experimental import pallas as pl
from jax.experimental.pallas import tpu as pltpu


def _round_up(v, m):
    return ((v + m - 1) // m) * m


def _min_sublane(dtype):
    # minimum second-to-last tile dim per element width (packing rule)
    return {1: 32, 2: 16, 4: 8}[jnp.dtype(dtype).itemsize]


def _vmem_capacity_bytes():
    """Generation-aware VMEM capacity; conservative fallback if unavailable."""
    try:
        info = pltpu.get_tpu_info()
        for attr in ("vmem_capacity_bytes", "vmem_size_bytes", "vmem_bytes"):
            cap = getattr(info, attr, None)
            if cap:
                return int(cap)
    except Exception:
        pass
    return 64 * 1024 * 1024   # v7x per-TC physical VMEM (smallest current gen)


def _stage1_vmem_bytes(tc, HW, BCr, S2pad, in_item, z_item, const_bufs):
    return (2 * tc * HW * in_item          # x slab (double-buffered)
            + 2 * BCr * tc * in_item       # weight slab (double-buffered)
            + const_bufs * HW * S2pad * in_item    # pool operator
            + const_bufs * BCr * S2pad * 4         # bias (+ folded mask)
            + 2 * BCr * S2pad * z_item     # z output block
            + BCr * S2pad * 4)             # f32 accumulator scratch


def _choose_tc(C, HW, BCr, S2pad, dtype, z_dtype, vmem_budget):
    min_sub = _min_sublane(dtype)
    in_item = jnp.dtype(dtype).itemsize
    z_item = jnp.dtype(z_dtype).itemsize
    legal = [c for c in (512, 256, 128, 64, 32, 16, 8)
             if c <= C and C % c == 0 and c % min_sub == 0]
    if not legal:
        return C
    for cand in legal:   # largest channel slab that fits the VMEM budget
        if _stage1_vmem_bytes(cand, HW, BCr, S2pad, in_item, z_item, 2) <= vmem_budget:
            return cand
    return legal[-1]


def _choose_tr(BCr, dtype):
    min_sub = _min_sublane(dtype)
    for cand in (256, 128, 64, 32, 16, 8):
        if cand <= BCr and BCr % cand == 0 and cand % min_sub == 0:
            return cand
    return BCr


# ----------------------------------------------------------------------------
# Stage 1: adaptive avg-pool (all branches) + 1x1 conv + BN shift + ReLU,
# evaluated at pooled resolution.  grid = (N, C//tc); c axis is a reduction.
#   x_ref    : (tc, HW)      channel slab of the input (flattened spatial)
#   w_ref    : (BCr, tc)     folded conv weights for this channel slab
#   pt_ref   : (HW, S2pad)   concat of kron(Ph,Pw)^T per branch, zero-padded
#   bias_ref : (BCr, S2pad)  folded BN shift; -1e30 at foreign/padded columns
#   z_ref    : (BCr, S2pad)  relu(conv + bias) for every branch, stacked
#   acc_ref  : (BCr, S2pad)  f32 accumulator scratch
# ----------------------------------------------------------------------------
def ppm_pool_conv_kernel(x_ref, w_ref, pt_ref, bias_ref, z_ref, acc_ref):
    c = pl.program_id(1)

    @pl.when(c == 0)
    def _init():
        acc_ref[...] = jnp.zeros_like(acc_ref)

    # Adaptive avg-pool of this channel slab for every branch at once.
    pooled = jnp.dot(x_ref[...], pt_ref[...],
                     preferred_element_type=jnp.float32)            # (tc, S2pad)

    # 1x1 conv (+ folded BN scale), accumulated over channel slabs.
    acc_ref[...] += jnp.dot(w_ref[...], pooled.astype(w_ref.dtype),
                            preferred_element_type=jnp.float32)     # (BCr, S2pad)

    @pl.when(c == pl.num_programs(1) - 1)
    def _finalize():
        # bias holds -1e30 at columns belonging to other branches / padding,
        # so the ReLU also performs the cross-branch masking (no mask operand).
        z_ref[...] = jnp.maximum(acc_ref[...] + bias_ref[...],
                                 0.0).astype(z_ref.dtype)


# ----------------------------------------------------------------------------
# Stage 2: bilinear upsample of every branch as one wide matmul, tiled output.
#   z_ref  : (tr, S2pad)   relu'd pooled features (row tile of stacked branches)
#   ut_ref : (S2pad, tw)   concat of kron(Uh,Uw)^T per branch (column tile)
#   o_ref  : (tr, tw)      upsampled output tile (written directly, no temp)
# ----------------------------------------------------------------------------
def ppm_upsample_kernel(z_ref, ut_ref, o_ref):
    o_ref[...] = jnp.dot(z_ref[...], ut_ref[...],
                         preferred_element_type=jnp.float32).astype(o_ref.dtype)


# ----------------------------------------------------------------------------
# Host-side: operator-matrix construction, parameter folding, pallas_call glue.
# ----------------------------------------------------------------------------
def adaptive_avg_pool_matrix(in_size, out_size):
    """(out, in) matrix reproducing nn.AdaptiveAvgPool2d along one axis."""
    P = np.zeros((out_size, in_size), np.float32)
    for i in range(out_size):
        start = (i * in_size) // out_size
        end = -((-(i + 1) * in_size) // out_size)   # ceil((i+1)*in/out)
        P[i, start:end] = 1.0 / (end - start)
    return P


def bilinear_upsample_matrix(in_size, out_size):
    """(out, in) matrix reproducing bilinear interp, align_corners=False."""
    U = np.zeros((out_size, in_size), np.float32)
    scale = in_size / out_size
    for i in range(out_size):
        src = max((i + 0.5) * scale - 0.5, 0.0)
        i0 = min(int(np.floor(src)), in_size - 1)
        i1 = min(i0 + 1, in_size - 1)
        w1 = src - i0
        U[i, i0] += 1.0 - w1
        U[i, i1] += w1
    return U


def make_branch_params(key, in_dim, reduction_dim):
    """Deterministic conv + BN params for one branch, folded for inference."""
    k0, k1, k2, k3, k4 = jax.random.split(key, 5)
    conv_w = 0.1 * jax.random.normal(k0, (reduction_dim, in_dim), jnp.float32)
    gamma = 1.0 + 0.1 * jax.random.normal(k1, (reduction_dim,), jnp.float32)
    beta = 0.1 * jax.random.normal(k2, (reduction_dim,), jnp.float32)
    run_mean = 0.1 * jax.random.normal(k3, (reduction_dim,), jnp.float32)
    run_var = 0.5 + 0.5 * jnp.abs(jax.random.normal(k4, (reduction_dim,),
                                                    jnp.float32))
    eps = 1e-5
    scale = gamma / jnp.sqrt(run_var + eps)
    w_eff = conv_w * scale[:, None]                      # folded conv*BN scale
    bias = (beta - scale * run_mean)[:, None]            # (Cr, 1)
    return w_eff, bias


def pyramid_pooling_module(x, setting, params, *, tc=None, tr=None, tw=None,
                           param_dtype=jnp.float32, out_dtype=jnp.float32):
    """Full forward: x (N, C, H, W) -> concat([x, branches...], axis=1)."""
    N, C, H, W = x.shape
    HW = H * W
    B = len(setting)
    Cr = params[0][0].shape[0]
    BCr = B * Cr

    in_item = jnp.dtype(param_dtype).itemsize
    z_item = in_item
    out_item = jnp.dtype(out_dtype).itemsize
    min_sub = _min_sublane(param_dtype)

    s2_list = [s * s for s in setting]
    offs = np.concatenate([[0], np.cumsum(s2_list)]).astype(np.int64)
    S2_total = int(offs[-1])
    S2pad = max(128, _round_up(S2_total, 128))          # lane-dense pooled axis

    # Lane-aligned padded spatial size + output tile width for stage 2.
    if tw is None:
        tw = 256 if HW >= 256 else 128
    assert tw % 128 == 0, tw
    HWp = _round_up(HW, tw)

    # ---- operator matrices / folded parameters (host-side numpy, free) ------
    NEG = np.float32(-1e30)
    pt_all = np.zeros((HW, S2pad), np.float32)
    ut_all = np.zeros((S2pad, HWp), np.float32)
    w_all = np.zeros((BCr, C), np.float32)
    bias_all = np.full((BCr, S2pad), NEG, np.float32)   # mask folded into bias
    for b, (s, (w_eff, bias)) in enumerate(zip(setting, params)):
        Ph = adaptive_avg_pool_matrix(H, s)
        Pw = adaptive_avg_pool_matrix(W, s)
        Uh = bilinear_upsample_matrix(s, H)
        Uw = bilinear_upsample_matrix(s, W)
        o0, o1 = int(offs[b]), int(offs[b + 1])
        pt_all[:, o0:o1] = np.kron(Ph, Pw).T             # (HW, s*s)
        ut_all[o0:o1, :HW] = np.kron(Uh, Uw).T           # (s*s, HW)
        w_all[b * Cr:(b + 1) * Cr, :] = np.asarray(w_eff)
        bias_all[b * Cr:(b + 1) * Cr, o0:o1] = np.asarray(bias)   # (Cr,1) bcast

    # ---- tiling choices ------------------------------------------------------
    cap = _vmem_capacity_bytes()
    vmem_limit = int(0.75 * cap)
    if tc is None:
        tc = _choose_tc(C, HW, BCr, S2pad, param_dtype, param_dtype,
                        int(0.6 * cap))
    assert C % tc == 0 and (tc % min_sub == 0 or tc == C), (C, tc, min_sub)
    num_ct = C // tc

    if tr is None:
        tr = _choose_tr(BCr, param_dtype)
    assert BCr % tr == 0 and HWp % tw == 0, (BCr, tr, HWp, tw)

    # ---- device operands -----------------------------------------------------
    x_flat = x.reshape(N, C, HW).astype(param_dtype)
    # (num_ct, BCr, tc): each channel-slab weight block is a full-extent,
    # lane-dense slice -> clean M=BCr / K=tc / N=S2pad matmul, no relayout.
    w3 = jnp.asarray(w_all.reshape(BCr, num_ct, tc).transpose(1, 0, 2),
                     dtype=param_dtype)
    pt_j = jnp.asarray(pt_all, dtype=param_dtype)
    ut_j = jnp.asarray(ut_all, dtype=param_dtype)
    bias_j = jnp.asarray(bias_all)                       # keep f32 (VPU path)

    # ---- cost estimates ------------------------------------------------------
    flops1 = 2 * N * C * S2pad * (HW + BCr)
    bytes1 = (N * C * HW * in_item + BCr * C * in_item + HW * S2pad * in_item
              + BCr * S2pad * 4 + N * BCr * S2pad * z_item)
    cost1 = pl.CostEstimate(flops=int(flops1), transcendentals=0,
                            bytes_accessed=int(bytes1))
    flops2 = 2 * N * BCr * S2pad * HWp
    bytes2 = (N * BCr * S2pad * z_item + S2pad * HWp * in_item
              + N * BCr * HWp * out_item)
    cost2 = pl.CostEstimate(flops=int(flops2), transcendentals=0,
                            bytes_accessed=int(bytes2))

    # ---- stage 1: pool + conv + BN shift + ReLU at pooled resolution --------
    def call_stage1(single_buffer_consts):
        const_kwargs = ({"pipeline_mode": pl.Buffered(buffer_count=1)}
                        if single_buffer_consts else {})
        return pl.pallas_call(
            ppm_pool_conv_kernel,
            out_shape=jax.ShapeDtypeStruct((N, BCr, S2pad), param_dtype),
            grid=(N, num_ct),
            in_specs=[
                pl.BlockSpec((pl.Squeezed(), tc, HW), lambda n, c: (n, c, 0)),
                pl.BlockSpec((pl.Squeezed(), BCr, tc), lambda n, c: (c, 0, 0)),
                pl.BlockSpec((HW, S2pad), lambda n, c: (0, 0), **const_kwargs),
                pl.BlockSpec((BCr, S2pad), lambda n, c: (0, 0), **const_kwargs),
            ],
            out_specs=pl.BlockSpec((pl.Squeezed(), BCr, S2pad),
                                   lambda n, c: (n, 0, 0)),
            scratch_shapes=[pltpu.VMEM((BCr, S2pad), jnp.float32)],
            compiler_params=pltpu.CompilerParams(
                dimension_semantics=("parallel", "arbitrary"),
                vmem_limit_bytes=vmem_limit),
            cost_estimate=cost1,
        )(x_flat, w3, pt_j, bias_j)

    try:
        z = call_stage1(True)
    except Exception:
        # Fallback for jax versions without BlockSpec.pipeline_mode /
        # single-buffering support (constants just get double-buffered).
        z = call_stage1(False)

    # ---- stage 2: one wide bilinear-upsample matmul, tiled writeback --------
    up = pl.pallas_call(
        ppm_upsample_kernel,
        out_shape=jax.ShapeDtypeStruct((N, BCr, HWp), out_dtype),
        grid=(N, BCr // tr, HWp // tw),
        in_specs=[
            pl.BlockSpec((pl.Squeezed(), tr, S2pad), lambda n, r, wi: (n, r, 0)),
            pl.BlockSpec((S2pad, tw), lambda n, r, wi: (0, wi)),
        ],
        out_specs=pl.BlockSpec((pl.Squeezed(), tr, tw),
                               lambda n, r, wi: (n, r, wi)),
        compiler_params=pltpu.CompilerParams(
            dimension_semantics=("parallel", "parallel", "parallel"),
            vmem_limit_bytes=vmem_limit),
        cost_estimate=cost2,
    )(z, ut_j)

    branch = up[:, :, :HW].reshape(N, BCr, H, W)
    return jnp.concatenate([x, branch.astype(x.dtype)], axis=1)


# ----------------------------------------------------------------------------
# Pure-JAX reference (original PyTorch op order) for a correctness sanity check
# ----------------------------------------------------------------------------
def reference_module(x, setting, params):
    N, C, H, W = x.shape
    outs = [x]
    for s, (w_eff, bias) in zip(setting, params):
        Ph = jnp.asarray(adaptive_avg_pool_matrix(H, s))
        Pw = jnp.asarray(adaptive_avg_pool_matrix(W, s))
        Uh = jnp.asarray(bilinear_upsample_matrix(s, H))
        Uw = jnp.asarray(bilinear_upsample_matrix(s, W))
        pooled = jnp.einsum('ih,nchw,jw->ncij', Ph, x, Pw)     # adaptive avg pool
        conv = jnp.einsum('oc,ncij->noij', w_eff, pooled)      # 1x1 conv * BN scale
        r = jnp.maximum(conv + bias[None, :, :, None], 0.0)    # BN shift + ReLU
        up = jnp.einsum('Hi,noij,Wj->noHW', Uh, r, Uw)         # bilinear upsample
        outs.append(up)
    return jnp.concatenate(outs, axis=1)


if __name__ == "__main__":
    # Small shapes consistent with the module: PSPNet-style setting (1,2,3,6),
    # in_dim divisible by len(setting).  tc=8 -> two channel slabs (exercises
    # the reduction/accumulation path); tr=8, tw=128 -> multi-tile stage 2.
    N, C, H, W = 2, 16, 16, 16
    setting = (1, 2, 3, 6)
    reduction_dim = C // len(setting)

    key = jax.random.PRNGKey(0)
    kx, kp = jax.random.split(key)
    x = jax.random.normal(kx, (N, C, H, W), jnp.float32)

    params = []
    for i, _ in enumerate(setting):
        params.append(make_branch_params(jax.random.fold_in(kp, i),
                                         C, reduction_dim))

    out = pyramid_pooling_module(x, setting, params, tc=8, tr=8, tw=128)
    out = jax.block_until_ready(out)

    expected_channels = C + len(setting) * reduction_dim
    assert out.shape == (N, expected_channels, H, W), out.shape

    ref = jax.block_until_ready(reference_module(x, setting, params))
    np.testing.assert_allclose(np.asarray(out), np.asarray(ref),
                               rtol=1e-4, atol=1e-4)

    print("KERNEL_OK")
</pallas_src>

<mosaic_0001>
module attributes {stable_mosaic.version = 11 : i64} {
  func.func @ppm_pool_conv_kernel(%arg0: i32, %arg1: i32, %arg2: memref<1x8x256xf32, #tpu.memory_space<vmem>>, %arg3: memref<1x16x8xf32, #tpu.memory_space<vmem>>, %arg4: memref<256x128xf32, #tpu.memory_space<vmem>>, %arg5: memref<16x128xf32, #tpu.memory_space<vmem>>, %arg6: memref<1x16x128xf32, #tpu.memory_space<vmem>>, %arg7: memref<16x128xf32, #tpu.memory_space<vmem>>) attributes {dimension_semantics = [#tpu.dimension_semantics<parallel>, #tpu.dimension_semantics<arbitrary>], iteration_bounds = array<i64: 2, 2>, scalar_prefetch = 0 : i64, scratch_operands = 1 : i64, tpu.core_type = #tpu.core_type<tc>, window_params = [{transform_indices = @transform_0, window_bounds = array<i64: 1, 8, 256>}, {transform_indices = @transform_1, window_bounds = array<i64: 1, 16, 8>}, {pipeline_mode = #tpu.pipeline_mode<synchronous>, transform_indices = @transform_2, window_bounds = array<i64: 256, 128>}, {pipeline_mode = #tpu.pipeline_mode<synchronous>, transform_indices = @transform_3, window_bounds = array<i64: 16, 128>}, {transform_indices = @transform_4, window_bounds = array<i64: 1, 16, 128>}]} {
    %c0_i32 = arith.constant 0 : i32
    %0 = arith.cmpi eq, %arg1, %c0_i32 : i32
    %1 = arith.extui %0 : i1 to i32
    %c0_i32_0 = arith.constant 0 : i32
    %2 = arith.cmpi ne, %1, %c0_i32_0 : i32
    scf.if %2 {
      %cst_14 = arith.constant 0.000000e+00 : f32
      %16 = vector.broadcast %cst_14 : f32 to vector<16x128xf32>
      %c0_15 = arith.constant 0 : index
      %c0_16 = arith.constant 0 : index
      %17 = vector.load %arg7[%c0_15, %c0_16] : memref<16x128xf32, #tpu.memory_space<vmem>>, vector<16x128xf32>
      tpu.vector_store %arg7[%c0_15, %c0_16], %16 {strides = array<i32>} : memref<16x128xf32, #tpu.memory_space<vmem>>, vector<16x128xf32>,
    } else {
    }
    %c0 = arith.constant 0 : index
    %c0_1 = arith.constant 0 : index
    %c0_2 = arith.constant 0 : index
    %3 = vector.load %arg2[%c0, %c0_1, %c0_2] : memref<1x8x256xf32, #tpu.memory_space<vmem>>, vector<1x8x256xf32>
    %4 = vector.shape_cast %3 : vector<1x8x256xf32> to vector<8x256xf32>
    %c0_3 = arith.constant 0 : index
    %c0_4 = arith.constant 0 : index
    %5 = vector.load %arg4[%c0_3, %c0_4] : memref<256x128xf32, #tpu.memory_space<vmem>>, vector<256x128xf32>
    %cst = arith.constant dense<0.000000e+00> : vector<8x128xf32>
    %6 = tpu.matmul %4, %5, %cst {dimension_numbers = #tpu.dot_dimension_numbers<[1], [0], [0], [1], [0, 0, 1, 1], [], []>} : vector<8x256xf32>, vector<256x128xf32>, vector<8x128xf32> -> vector<8x128xf32>
    %c0_5 = arith.constant 0 : index
    %c0_6 = arith.constant 0 : index
    %7 = vector.load %arg7[%c0_5, %c0_6] : memref<16x128xf32, #tpu.memory_space<vmem>>, vector<16x128xf32>
    %c0_7 = arith.constant 0 : index
    %c0_8 = arith.constant 0 : index
    %c0_9 = arith.constant 0 : index
    %8 = vector.load %arg3[%c0_7, %c0_8, %c0_9] : memref<1x16x8xf32, #tpu.memory_space<vmem>>, vector<1x16x8xf32>
    %9 = vector.shape_cast %8 : vector<1x16x8xf32> to vector<16x8xf32>
    %cst_10 = arith.constant dense<0.000000e+00> : vector<16x128xf32>
    %10 = tpu.matmul %9, %6, %cst_10 {dimension_numbers = #tpu.dot_dimension_numbers<[1], [0], [0], [1], [0, 0, 1, 1], [], []>} : vector<16x8xf32>, vector<8x128xf32>, vector<16x128xf32> -> vector<16x128xf32>
    %11 = arith.addf %7, %10 : vector<16x128xf32>
    %c0_11 = arith.constant 0 : index
    %c0_12 = arith.constant 0 : index
    %12 = vector.load %arg7[%c0_11, %c0_12] : memref<16x128xf32, #tpu.memory_space<vmem>>, vector<16x128xf32>
    tpu.vector_store %arg7[%c0_11, %c0_12], %11 {strides = array<i32>} : memref<16x128xf32, #tpu.memory_space<vmem>>, vector<16x128xf32>,
    %c1_i32 = arith.constant 1 : i32
    %13 = arith.cmpi eq, %arg1, %c1_i32 : i32
    %14 = arith.extui %13 : i1 to i32
    %c0_i32_13 = arith.constant 0 : i32
    %15 = arith.cmpi ne, %14, %c0_i32_13 : i32
    scf.if %15 {
      %c0_14 = arith.constant 0 : index
      %c0_15 = arith.constant 0 : index
      %16 = vector.load %arg7[%c0_14, %c0_15] : memref<16x128xf32, #tpu.memory_space<vmem>>, vector<16x128xf32>
      %c0_16 = arith.constant 0 : index
      %c0_17 = arith.constant 0 : index
      %17 = vector.load %arg5[%c0_16, %c0_17] : memref<16x128xf32, #tpu.memory_space<vmem>>, vector<16x128xf32>
      %18 = arith.addf %16, %17 : vector<16x128xf32>
      %cst_18 = arith.constant 0.000000e+00 : f32
      %19 = vector.broadcast %cst_18 : f32 to vector<16x128xf32>
      %20 = arith.maximumf %18, %19 : vector<16x128xf32>
      %c0_19 = arith.constant 0 : index
      %c0_20 = arith.constant 0 : index
      %c0_21 = arith.constant 0 : index
      %21 = vector.load %arg6[%c0_19, %c0_20, %c0_21] : memref<1x16x128xf32, #tpu.memory_space<vmem>>, vector<1x16x128xf32>
      %22 = vector.shape_cast %21 : vector<1x16x128xf32> to vector<16x128xf32>
      %23 = vector.shape_cast %20 : vector<16x128xf32> to vector<1x16x128xf32>
      tpu.vector_store %arg6[%c0_19, %c0_20, %c0_21], %23 {strides = array<i32>} : memref<1x16x128xf32, #tpu.memory_space<vmem>>, vector<1x16x128xf32>,
    } else {
    }
    return
  }
  func.func @transform_0(%arg0: i32, %arg1: i32) -> (i32, i32, i32) {
    %c0_i32 = arith.constant 0 : i32
    %c0_i32_0 = arith.constant 0 : i32
    return %arg0, %arg1, %c0_i32 : i32, i32, i32
  }
  func.func @transform_1(%arg0: i32, %arg1: i32) -> (i32, i32, i32) {
    %c0_i32 = arith.constant 0 : i32
    %c0_i32_0 = arith.constant 0 : i32
    %c0_i32_1 = arith.constant 0 : i32
    return %arg1, %c0_i32, %c0_i32_0 : i32, i32, i32
  }
  func.func @transform_2(%arg0: i32, %arg1: i32) -> (i32, i32) {
    %c0_i32 = arith.constant 0 : i32
    %c0_i32_0 = arith.constant 0 : i32
    %c0_i32_1 = arith.constant 0 : i32
    return %c0_i32, %c0_i32_0 : i32, i32
  }
  func.func @transform_3(%arg0: i32, %arg1: i32) -> (i32, i32) {
    %c0_i32 = arith.constant 0 : i32
    %c0_i32_0 = arith.constant 0 : i32
    %c0_i32_1 = arith.constant 0 : i32
    return %c0_i32, %c0_i32_0 : i32, i32
  }
  func.func @transform_4(%arg0: i32, %arg1: i32) -> (i32, i32, i32) {
    %c0_i32 = arith.constant 0 : i32
    %c0_i32_0 = arith.constant 0 : i32
    %c0_i32_1 = arith.constant 0 : i32
    return %arg0, %c0_i32, %c0_i32_0 : i32, i32, i32
  }
}

module attributes {stable_mosaic.version = 11 : i64} {
  func.func @ppm_pool_conv_kernel(%arg0: i32, %arg1: i32, %arg2: memref<1x8x256xf32, #tpu.memory_space<vmem>>, %arg3: memref<1x16x8xf32, #tpu.memory_space<vmem>>, %arg4: memref<256x128xf32, #tpu.memory_space<vmem>>, %arg5: memref<16x128xf32, #tpu.memory_space<vmem>>, %arg6: memref<1x16x128xf32, #tpu.memory_space<vmem>>, %arg7: memref<16x128xf32, #tpu.memory_space<vmem>>) attributes {dimension_semantics = [#tpu.dimension_semantics<parallel>, #tpu.dimension_semantics<arbitrary>], iteration_bounds = array<i64: 2, 2>, scalar_prefetch = 0 : i64, scratch_operands = 1 : i64, tpu.core_type = #tpu.core_type<tc>, window_params = [{transform_indices = @transform_0, window_bounds = array<i64: 1, 8, 256>}, {transform_indices = @transform_1, window_bounds = array<i64: 1, 16, 8>}, {pipeline_mode = #tpu.pipeline_mode<synchronous>, transform_indices = @transform_2, window_bounds = array<i64: 256, 128>}, {pipeline_mode = #tpu.pipeline_mode<synchronous>, transform_indices = @transform_3, window_bounds = array<i64: 16, 128>}, {transform_indices = @transform_4, window_bounds = array<i64: 1, 16, 128>}]} {
    %c0_i32 = arith.constant 0 : i32
    %0 = arith.cmpi eq, %arg1, %c0_i32 : i32
    %1 = arith.extui %0 : i1 to i32
    %c0_i32_0 = arith.constant 0 : i32
    %2 = arith.cmpi ne, %1, %c0_i32_0 : i32
    scf.if %2 {
      %cst_14 = arith.constant 0.000000e+00 : f32
      %16 = vector.broadcast %cst_14 : f32 to vector<16x128xf32>
      %c0_15 = arith.constant 0 : index
      %c0_16 = arith.constant 0 : index
      %17 = vector.load %arg7[%c0_15, %c0_16] : memref<16x128xf32, #tpu.memory_space<vmem>>, vector<16x128xf32>
      tpu.vector_store %arg7[%c0_15, %c0_16], %16 {strides = array<i32>} : memref<16x128xf32, #tpu.memory_space<vmem>>, vector<16x128xf32>,
    } else {
    }
    %c0 = arith.constant 0 : index
    %c0_1 = arith.constant 0 : index
    %c0_2 = arith.constant 0 : index
    %3 = vector.load %arg2[%c0, %c0_1, %c0_2] : memref<1x8x256xf32, #tpu.memory_space<vmem>>, vector<1x8x256xf32>
    %4 = vector.shape_cast %3 : vector<1x8x256xf32> to vector<8x256xf32>
    %c0_3 = arith.constant 0 : index
    %c0_4 = arith.constant 0 : index
    %5 = vector.load %arg4[%c0_3, %c0_4] : memref<256x128xf32, #tpu.memory_space<vmem>>, vector<256x128xf32>
    %cst = arith.constant dense<0.000000e+00> : vector<8x128xf32>
    %6 = tpu.matmul %4, %5, %cst {dimension_numbers = #tpu.dot_dimension_numbers<[1], [0], [0], [1], [0, 0, 1, 1], [], []>} : vector<8x256xf32>, vector<256x128xf32>, vector<8x128xf32> -> vector<8x128xf32>
    %c0_5 = arith.constant 0 : index
    %c0_6 = arith.constant 0 : index
    %7 = vector.load %arg7[%c0_5, %c0_6] : memref<16x128xf32, #tpu.memory_space<vmem>>, vector<16x128xf32>
    %c0_7 = arith.constant 0 : index
    %c0_8 = arith.constant 0 : index
    %c0_9 = arith.constant 0 : index
    %8 = vector.load %arg3[%c0_7, %c0_8, %c0_9] : memref<1x16x8xf32, #tpu.memory_space<vmem>>, vector<1x16x8xf32>
    %9 = vector.shape_cast %8 : vector<1x16x8xf32> to vector<16x8xf32>
    %cst_10 = arith.constant dense<0.000000e+00> : vector<16x128xf32>
    %10 = tpu.matmul %9, %6, %cst_10 {dimension_numbers = #tpu.dot_dimension_numbers<[1], [0], [0], [1], [0, 0, 1, 1], [], []>} : vector<16x8xf32>, vector<8x128xf32>, vector<16x128xf32> -> vector<16x128xf32>
    %11 = arith.addf %7, %10 : vector<16x128xf32>
    %c0_11 = arith.constant 0 : index
    %c0_12 = arith.constant 0 : index
    %12 = vector.load %arg7[%c0_11, %c0_12] : memref<16x128xf32, #tpu.memory_space<vmem>>, vector<16x128xf32>
    tpu.vector_store %arg7[%c0_11, %c0_12], %11 {strides = array<i32>} : memref<16x128xf32, #tpu.memory_space<vmem>>, vector<16x128xf32>,
    %c1_i32 = arith.constant 1 : i32
    %13 = arith.cmpi eq, %arg1, %c1_i32 : i32
    %14 = arith.extui %13 : i1 to i32
    %c0_i32_13 = arith.constant 0 : i32
    %15 = arith.cmpi ne, %14, %c0_i32_13 : i32
    scf.if %15 {
      %c0_14 = arith.constant 0 : index
      %c0_15 = arith.constant 0 : index
      %16 = vector.load %arg7[%c0_14, %c0_15] : memref<16x128xf32, #tpu.memory_space<vmem>>, vector<16x128xf32>
      %c0_16 = arith.constant 0 : index
      %c0_17 = arith.constant 0 : index
      %17 = vector.load %arg5[%c0_16, %c0_17] : memref<16x128xf32, #tpu.memory_space<vmem>>, vector<16x128xf32>
      %18 = arith.addf %16, %17 : vector<16x128xf32>
      %cst_18 = arith.constant 0.000000e+00 : f32
      %19 = vector.broadcast %cst_18 : f32 to vector<16x128xf32>
      %20 = arith.maximumf %18, %19 : vector<16x128xf32>
      %c0_19 = arith.constant 0 : index
      %c0_20 = arith.constant 0 : index
      %c0_21 = arith.constant 0 : index
      %21 = vector.load %arg6[%c0_19, %c0_20, %c0_21] : memref<1x16x128xf32, #tpu.memory_space<vmem>>, vector<1x16x128xf32>
      %22 = vector.shape_cast %21 : vector<1x16x128xf32> to vector<16x128xf32>
      %23 = vector.shape_cast %20 : vector<16x128xf32> to vector<1x16x128xf32>
      tpu.vector_store %arg6[%c0_19, %c0_20, %c0_21], %23 {strides = array<i32>} : memref<1x16x128xf32, #tpu.memory_space<vmem>>, vector<1x16x128xf32>,
    } else {
    }
    return
  }
  func.func @transform_0(%arg0: i32, %arg1: i32) -> (i32, i32, i32) {
    %c0_i32 = arith.constant 0 : i32
    %c0_i32_0 = arith.constant 0 : i32
    return %arg0, %arg1, %c0_i32 : i32, i32, i32
  }
  func.func @transform_1(%arg0: i32, %arg1: i32) -> (i32, i32, i32) {
    %c0_i32 = arith.constant 0 : i32
    %c0_i32_0 = arith.constant 0 : i32
    %c0_i32_1 = arith.constant 0 : i32
    return %arg1, %c0_i32, %c0_i32_0 : i32, i32, i32
  }
  func.func @transform_2(%arg0: i32, %arg1: i32) -> (i32, i32) {
    %c0_i32 = arith.constant 0 : i32
    %c0_i32_0 = arith.constant 0 : i32
    %c0_i32_1 = arith.constant 0 : i32
    return %c0_i32, %c0_i32_0 : i32, i32
  }
  func.func @transform_3(%arg0: i32, %arg1: i32) -> (i32, i32) {
    %c0_i32 = arith.constant 0 : i32
    %c0_i32_0 = arith.constant 0 : i32
    %c0_i32_1 = arith.constant 0 : i32
    return %c0_i32, %c0_i32_0 : i32, i32
  }
  func.func @transform_4(%arg0: i32, %arg1: i32) -> (i32, i32, i32) {
    %c0_i32 = arith.constant 0 : i32
    %c0_i32_0 = arith.constant 0 : i32
    %c0_i32_1 = arith.constant 0 : i32
    return %arg0, %c0_i32, %c0_i32_0 : i32, i32, i32
  }
}

</mosaic_0001>

<bundles_post_ra>
// kernel: tpu_custom_call.1
= control target key start
LH: loop header
LB: loop body
LE: loop exit
PB: predicated region body
PF: predicated region fallthrough
CT: control target
= control target key end

     0   :  { %s1251_s0 = inlined_call_operand.hbm [shape: f32[2,16,256], index: 0, kind: input, shape index: {}]   ;;  %s1252_s1 = inlined_call_operand.vmem [shape: f32[2,16,8], index: 1, kind: input, shape index: {}]   ;;  %s1253_s2 = inlined_call_operand.hbm [shape: f32[256,128], index: 2, kind: input, shape index: {}]   ;;  %s1254_s3 = inlined_call_operand.vmem [shape: f32[16,128], index: 3, kind: input, shape index: {}]   ;;  %s1255_s4 = inlined_call_operand.hbm [shape: f32[2,16,128], index: 4, kind: output, shape index: {}]  }
   0x1   :  { %1264 = sst [smem:[#allocation17_spill]] %s1253_s2 }
   0x2   :  { %1265 = sst [smem:[#allocation18_spill]] %s1254_s3 }
   0x3   :  { %1266 = sst [smem:[#allocation19_spill]] %s1255_s4 }
   0x4   :  { %9 = vsyncpa [#allocation4], 0 }
   0x5   :  { %11 = vsyncpa [#allocation4 + $0x1], 0 }
   0x6   :  { %12 = vsyncpa [#allocation7], 0 }
   0x7   :  { %13 = vsyncpa [#allocation5], 0 }
   0x8   :  { %15 = vsyncpa [#allocation5 + $0x1], 0  ;;  %s1002_s15 = smov 0   ;;  %s1004_s16 = smov 0  }
   0x9   :  { %s1006_s17 = smov 0   ;;  %s1008_s18 = smov 0  }
   0xa   :  { %s1010_s19 = smov 0   ;;  %s1012_s20 = smov 0  }
   0xb   :  { %s1014_s21 = smov 0   ;;  %s1016_s22 = smov 0  }
   0xc   :  { %s1018_s23 = smov 0   ;;  %s1020_s24 = smov 0  }
   0xd   :  { %s1022_s25 = smov 0  }
   0xe LB: > { %1267 = sst [smem:[#allocation12_spill]] %s927_s15  ;;  %s602_s26 = sadd.s32 4294967295, %s967_s25   ;;  %s967_s25 = sphi %s1022_s25, %s21_s25   ;;  %s963_s24 = sphi %s1020_s24, %s1299_s24   ;;  %s959_s23 = sphi %s1018_s23, %s1298_s23   ;;  %s955_s22 = sphi %s1016_s22, %s1297_s22   ;;  %s951_s21 = sphi %s1014_s21, %s1296_s21   ;;  %s947_s20 = sphi %s1012_s20, %s1295_s20   ;;  %s943_s19 = sphi %s1010_s19, %s1294_s19   ;;  %s939_s18 = sphi %s1008_s18, %s1293_s18   ;;  %s935_s17 = sphi %s1006_s17, %s1292_s17   ;;  %s931_s16 = sphi %s1004_s16, %s1291_s16   ;;  %s927_s15 = sphi %s1002_s15, %s1290_s15  }
   0xf   : > { %1268 = sst [smem:[#allocation13_spill]] %s955_s22  ;;  %s603_s27 = sadd.s32 4294967294, %s967_s25  }
  0x10   : > { %p55_p0 = scmp.ne.s32.totalorder %s943_s19, %s939_s18  ;;  %p1058_p1 = scmp.eq.s32.totalorder %s602_s26, 0 }
  0x11   : > { %p146_p2 = scmp.ne.s32.totalorder %s935_s17, %s931_s16  ;;  %p147_p3 = scmp.eq.s32.totalorder %s602_s26, 3 }
  0x12   : > { %p1066_p4 = por %p1058_p1, %p55_p0  ;;  %p152_p5 = scmp.ne.s32.totalorder %s931_s16, %s927_s15 }
  0x13   : > { %p1072_p6 = por %p147_p3, %p146_p2  ;;  %p153_p7 = scmp.eq.s32.totalorder %s603_s27, 3 }
  0x14   : > { %p604_p8 = scmp.ge.s32.totalorder %s967_s25, 1  ;;  %p160_p9 = scmp.lt.s32.totalorder %s967_s25, 5 }
  0x15   : > { %s1271_s30 = scalar_select %p1072_p6, 1, 0 }
  0x16   : > { %p1078_p10 = por %p153_p7, %p152_p5  ;;  %p1082_p11 = pnand %p604_p8, %p160_p9 }
  0x17   : > { %1272 = sst [smem:[#allocation14_spill]] %s1271_s30  ;;  %s969_s7 = smov [#allocation6]  }
  0x18   : > { %s1273_s5 = scalar_select %p1078_p10, 1, 0 }
  0x19   : > { %s172_s8 = sshll.u32 %s969_s7, 4  ;;  %p679_p12 = pneg %p1082_p11  ;;  %s173_s8 = int_to_ptr.vmem [resolvable:$true] %s172_s8 }
  0x1a   : > { %1274 = sst [smem:[#allocation15_spill]] %s1273_s5  ;;  %s800_s9 = scalar_lea.vmem %s173_s8, 4096 }
  0x1b   : > { %p680_p13 = pnand %p679_p12, %p1058_p1  ;;  %p801_p2 = scmp.ne.s32.totalorder %s173_s8, %s800_s9 }
  0x1c   : > { %p808_p7 = scmp.lt.s32.totalorder %s173_s8, %s173_s8  ;;  %p809_p6 = scmp.lt.s32.totalorder %s800_s9, %s800_s9 }
  0x1d   : > { %p791_p0 = pneg %p680_p13 }
  0x1e   : > { %p810_p10 = por %p809_p6, %p808_p7 }
  0x1f   : > { %p803_p3 = pnand %p801_p2, %p791_p0 }
  0x21   : > { %p804_p5 = pneg %p803_p3 }
  0x23   : > { %p811_p8 = pnand %p810_p10, %p804_p5 }
  0x25   : > { %814 = shalt.err (!%p811_p8)
}
  0x26   : > { %s970_s10 = smov 128   ;;  %s971_s11 = smov 8  }
  0x27   : > { %s1276_s2 = sld [smem:[#allocation17_spill]]  ;;  %s30_s14 = sadd.s32 1, %s959_s23 }
  0x28   : > { %s33_s18 = sadd.s32 1, %s963_s24  ;;  %p31_p6 = scmp.ge.s32.totalorder %s30_s14, 2 }
  0x29   : > { %s42_s26 = sadd.s32 1, %s947_s20  ;;  %p49_p9 = scmp.ne.s32.totalorder %s947_s20, %s943_s19 }
  0x2a   : > { %p50_p10 = scmp.eq.s32.totalorder %s967_s25, 0  ;;  %s1301_s14 = smov (%p31_p6, %s30_s14), 0 }
  0x2b   : > { %1277 = sst [smem:[#allocation16_spill]] %s1301_s14  ;;  %s1303_s18 = smov (!%p31_p6, %s33_s18), %s963_s24 }
  0x2c   : > { %s38_s27 = ssub.s32 %s959_s23, %s1301_s14  ;;  %p1104_p12 = por %p50_p10, %p49_p9 }
  0x2d   : > { %682 = dma.hbm_to_vmem [thread:$0]  (!%p680_p13), %s1276_s2, 4096, %s173_s8, [#allocation7], %s970_s10, %s970_s10, %s971_s11  }
  0x2e   : > { %p35_p13 = scmp.ge.s32.totalorder %s1303_s18, 2  ;;  %s136_s8 = sadd.s32 1, %s935_s17 }
  0x2f   : > { %p692_p0 = scmp.lt.s32.totalorder %s967_s25, 4  ;;  %s189_s9 = sand.u32 1, %s947_s20  }
  0x30   : > { %s1305_s18 = smov (%p35_p13, %s1303_s18), 0  ;;  %s607_s10 = sshll.u32 %s189_s9, 4 }
  0x31   : > { %s37_s11 = ssub.s32 %s963_s24, %s1305_s18  ;;  %s608_s13 = sshll.u32 %s959_s23, 1 }
  0x32   : > { %s39_s12 = sor.u32 %s38_s27, %s37_s11  ;;  %p134_p2 = scmp.eq.s32.totalorder %s37_s11, 0 }
  0x33   : > { %p40_p3 = scmp.eq.s32.totalorder %s39_s12, 0  ;;  %s609_s5 = sshll.u32 %s963_s24, 2 }
  0x34   : > { %s1117_s2 = scalar_select %p134_p2, %s935_s17, %s136_s8  }
  0x35   : > { %s1120_s14 = scalar_select %p40_p3, %s947_s20, %s42_s26  }
  0x36   : > { %s193_s15 = scalar_lea.vmem [#allocation3], %s607_s10  ;;  %s199_s30 = sadd.s32 %s609_s5, %s608_s13 }
  0x37   : > { %s203_s4 = sshll.u32 %s193_s15, 4  ;;  %s610_s22 = sshll.u32 %s199_s30, 7  ;;  %s204_s4 = int_to_ptr.vmem [resolvable:$true] %s203_s4 }
  0x38   : > { %p1127_p5 = pnand %p692_p0, %p1104_p12  ;;  %s201_s8 = scalar_lea.hbm %s1251_s0, %s610_s22 }
  0x39   : > { %s190_s12 = scalar_lea.sflag [#allocation4], %s189_s9  ;;  %s828_s26 = scalar_lea.vmem %s204_s4, 256 }
  0x3a   : > { %p817_p7 = pneg %p1127_p5  ;;  %p829_p8 = scmp.ne.s32.totalorder %s204_s4, %s828_s26 }
  0x3b   : > { %s972_s15 = smov [#allocation3]  }
  0x3c   : > { %p831_p6 = pnand %p829_p8, %p817_p7  ;;  %s833_s30 = sshll.u32 %s972_s15, 4  ;;  %s834_s30 = int_to_ptr.vmem [resolvable:$false] %s833_s30 }
  0x3d   : > { %s835_s5 = scalar_lea.vmem %s834_s30, 512  ;;  %p836_p10 = scmp.lt.s32.totalorder %s204_s4, %s834_s30 }
  0x3e   : > { %p832_p9 = pneg %p831_p6  ;;  %p837_p12 = scmp.lt.s32.totalorder %s835_s5, %s828_s26 }
  0x40   : > { %p838_p13 = por %p837_p12, %p836_p10 }
  0x42   : > { %p839_p0 = pnand %p838_p13, %p832_p9 }
  0x44   : > { %842 = shalt.err (!%p839_p0)
}
  0x45   : > { %686 = dma.hbm_to_vmem [thread:$0]  (!%p1127_p5), %s201_s8, 256, %s204_s4, %s190_s12  }
  0x46   : > { %220 = sbr.rel (%p1082_p11) target bundleno = 558 (0x22e), region = 36  ;;  %s222_s22 = sand.u32 (!%p1082_p11), 1, %s943_s19  }
  0x47   : > { %s1141_s7 = sshll.u32 (!%p1082_p11), %s222_s22, 4  ;;  %s223_s9 = scalar_lea.sflag (!%p1082_p11), [#allocation4], %s222_s22 }
  0x48   : > { %s226_s10 = scalar_lea.vmem (!%p1082_p11), [#allocation3], %s1141_s7 }
  0x4b   : > { %914 = dma.done.wait (%p1066_p4), %s223_s9, 256  }
  0x4c   : > { %916 = vsyncadd (%p1066_p4), %s223_s9, 4294967040 }
  0x4d   : > { %918 = dma.done.wait (%p1058_p1), [#allocation7], 4096  }
  0x4e   : > { %920 = vsyncadd (%p1058_p1), [#allocation7], 4294963200  ;;  %s257_s3 = sand.u32 1, %s931_s16   ;;  %p260_p11 = scmp.lt.s32.totalorder %s951_s21, 1 }
  0x4f   : > { %s614_s4 = sshll.u32 %s257_s3, 4  ;;  %p617_p4 = scmp.ne.s32.totalorder %s951_s21, 0 }
  0x50   : > { %s261_s6 = scalar_select %p260_p11, %s951_s21, 1 }
  0x51   : > { %s1162_s8 = scalar_lea.vmem [#allocation8], %s614_s4  ;;  %268 = sbr.rel (%p617_p4) target bundleno = 88 (0x58), region = 48 }
  0x52   : > { %s626_s13 = sshll.u32 %s261_s6, 4 }
  0x53   : > { %s1160_s29 = scalar_lea.vmem %s1252_s1, %s626_s13 }
  0x56   : > { %v973_v0 = vmov 0.0  }
  0x57   : > { %269 = vst [vmem:[#allocation2] sm:$0xff] %v973_v0  ;;  %270 = vst [vmem:[#allocation2 + $0x8] sm:$0xff] %v973_v0 }
  0x58 PF: > { %v304_v1 = vld [vmem:[#allocation6 + $0xf8] sm:$0xff]  ;;  %v303_v3 = vld [vmem:[#allocation6 + $0xf0] sm:$0xff]  ;;  %v302_v5 = vld [vmem:[#allocation6 + $0xe8] sm:$0xff]  ;;  %vm379_vm0 = vcmask 64512   ;;  %p620_p1 = scmp.ne.s32.totalorder %s951_s21, 1 }
  0x59   : > { %v288_v2 = vld [vmem:[#allocation6 + $0x78] sm:$0xff]  ;;  %628 = vmatprep.subr.mxu0 %v304_v1  ;;  %v287_v4 = vld [vmem:[#allocation6 + $0x70] sm:$0xff]  ;;  %v286_v6 = vld [vmem:[#allocation6 + $0x68] sm:$0xff]  ;;  %s1280_s26 = sld [smem:[#allocation18_spill]] (!%p620_p1) }
  0x5a   : > { %629 = vmatpush3.msra.mxu0 %v288_v2  ;;  %v301_v7 = vld [vmem:[#allocation6 + $0xe0] sm:$0xff]  ;;  %v300_v9 = vld [vmem:[#allocation6 + $0xd8] sm:$0xff]  ;;  %v299_v11 = vld [vmem:[#allocation6 + $0xd0] sm:$0xff] }
  0x5b   : > { %630 = vmatprep.subr.mxu0 %v303_v3  ;;  %v285_v8 = vld [vmem:[#allocation6 + $0x60] sm:$0xff]  ;;  %v284_v10 = vld [vmem:[#allocation6 + $0x58] sm:$0xff]  ;;  %v283_v12 = vld [vmem:[#allocation6 + $0x50] sm:$0xff] }
  0x5c   : > { %631 = vmatpush3.msra.mxu0 %v287_v4  ;;  %v298_v13 = vld [vmem:[#allocation6 + $0xc8] sm:$0xff]  ;;  %v297_v16 = vld [vmem:[#allocation6 + $0xc0] sm:$0xff]  ;;  %v296_v18 = vld [vmem:[#allocation6 + $0xb8] sm:$0xff] }
  0x5d   : > { %632 = vmatprep.subr.mxu0 %v302_v5  ;;  %v272_v14 = vld [vmem:[%s226_s10 + $0x8] sm:$0xff]  ;;  %v281_v17 = vld [vmem:[#allocation6 + $0x40] sm:$0xff]  ;;  %v295_v20 = vld [vmem:[#allocation6 + $0xb0] sm:$0xff] }
  0x5e   : > { %633 = vmatpush3.msra.mxu0 %v286_v6  ;;  %v282_v15 = vld [vmem:[#allocation6 + $0x48] sm:$0xff]  ;;  %369 = vmatprep.mubr.f32.mxu0 %v272_v14  ;;  %v280_v19 = vld [vmem:[#allocation6 + $0x38] sm:$0xff]  ;;  %v279_v21 = vld [vmem:[#allocation6 + $0x30] sm:$0xff] }
  0x5f   : > { %634 = vmatprep.subr.mxu0 %v301_v7  ;;  %v294_v22 = vld [vmem:[#allocation6 + $0xa8] sm:$0xff]  ;;  %v293_v24 = vld [vmem:[#allocation6 + $0xa0] sm:$0xff]  ;;  %v292_v26 = vld [vmem:[#allocation6 + $0x98] sm:$0xff] }
  0x60   : > { %635 = vmatpush3.msra.mxu0 %v285_v8  ;;  %v278_v23 = vld [vmem:[#allocation6 + $0x28] sm:$0xff]  ;;  %v277_v25 = vld [vmem:[#allocation6 + $0x20] sm:$0xff]  ;;  %v276_v27 = vld [vmem:[#allocation6 + $0x18] sm:$0xff] }
  0x61   : > { %636 = vmatprep.subr.mxu0 %v300_v9  ;;  %v291_v28 = vld [vmem:[#allocation6 + $0x90] sm:$0xff]  ;;  %v290_v30 = vld [vmem:[#allocation6 + $0x88] sm:$0xff]  ;;  %v289_v32 = vld [vmem:[#allocation6 + $0x80] sm:$0xff] }
  0x62   : > { %637 = vmatpush3.msra.mxu0 %v284_v10  ;;  %v275_v29 = vld [vmem:[#allocation6 + $0x10] sm:$0xff]  ;;  %v274_v31 = vld [vmem:[#allocation6 + $0x8] sm:$0xff]  ;;  %v273_v33 = vld [vmem:[#allocation6] sm:$0xff] }
  0x63   : > { %638 = vmatprep.subr.mxu0 %v299_v11  ;;  %v271_v34 = vld [vmem:[%s226_s10] sm:$0xff]  ;;  %v378_v39 = vld [vmem:[%s1160_s29 + $0x8] sm:$0xff] }
  0x64   : > { %639 = vmatpush3.msra.mxu0 %v283_v12  ;;  %v377_v35 = vld [vmem:[%s1160_s29] sm:$0xff]  ;;  %v376_v40 = vld [vmem:[#allocation2 + $0x8] sm:$0xff] }
  0x65   : > { %640 = vmatprep.subr.mxu0 %v298_v13  ;;  %668 = vmatprep.mubr.msk.f32.mxu1 %vm379_vm0, %v377_v35  ;;  %v375_v42 = vld [vmem:[#allocation2] sm:$0xff] }
  0x66   : > { %641 = vmatpush3.msra.mxu0 %v282_v15 }
  0x67   : > { %642 = vmatprep.subr.mxu0 %v297_v16 }
  0x68   : > { %643 = vmatpush3.msra.mxu0 %v281_v17 }
  0x69   : > { %644 = vmatprep.subr.mxu0 %v296_v18 }
  0x6a   : > { %645 = vmatpush3.msra.mxu0 %v280_v19 }
  0x6b   : > { %646 = vmatprep.subr.mxu0 %v295_v20 }
  0x6c   : > { %647 = vmatpush3.msra.mxu0 %v279_v21 }
  0x6d   : > { %648 = vmatprep.subr.mxu0 %v294_v22 }
  0x6e   : > { %649 = vmatpush3.msra.mxu0 %v278_v23 }
  0x6f   : > { %650 = vmatprep.subr.mxu0 %v293_v24 }
  0x70   : > { %651 = vmatpush3.msra.mxu0 %v277_v25 }
  0x71   : > { %652 = vmatprep.subr.mxu0 %v292_v26 }
  0x72   : > { %653 = vmatpush3.msra.mxu0 %v276_v27 }
  0x73   : > { %654 = vmatprep.subr.mxu0 %v291_v28 }
  0x74   : > { %655 = vmatpush3.msra.mxu0 %v275_v29 }
  0x75   : > { %656 = vmatprep.subr.mxu0 %v290_v30 }
  0x76   : > { %657 = vmatpush3.msra.mxu0 %v274_v31 }
  0x77   : > { %658 = vmatprep.subr.mxu0 %v289_v32 }
  0x78   : > { %659 = vmatpush3.msra.mxu0 %v273_v33 }
  0x79   : > { %370 = vmatmul.mubr.f32.vlgmr.msra.gmra.mxu0 %v271_v34 }
 0x139   : > { %v660_v36 = vpop.f32.mrf.mxu0 }
 0x13b   : > { %v661_v37 = vpop.f32.mrf.mxu0 }
 0x13c   : > { %v662_v38 = vadd.f32 %v661_v37, %v660_v36 }
 0x13e   : > { %666 = vmatprep.subr.mxu1 %v662_v38 }
 0x13f   : > { %667 = vmatpush3.msra.mxu1 %v662_v38 }
 0x140   : > { %669 = vmatmul.mubr.msk.f32.vlgmr.msra.gmra.mxu1 %vm379_vm0, %v378_v39 }
 0x200   : > { %v670_v41 = vpop.f32.mrf.mxu1 }
 0x201   : > { %v462_v43 = vadd.f32 %v670_v41, %v376_v40  ;;  %468 = sbr.rel (%p620_p1) target bundleno = 530 (0x212), region = 52 }
 0x202   : > { %v452_v44 = vpop.f32.mrf.mxu1 }
 0x203   : > { %464 = vst [vmem:[#allocation2 + $0x8] sm:$0xff] %v462_v43  ;;  %v461_v45 = vadd.f32 %v452_v44, %v375_v42 }
 0x205   : > { %463 = vst [vmem:[#allocation2] sm:$0xff] %v461_v45 }
 0x206   : > { %v471_v47 = vld [vmem:[%s1280_s26] sm:$0xff]  ;;  %v472_v50 = vld [vmem:[%s1280_s26 + $0x8] sm:$0xff] }
 0x20a   : > { %v470_v48 = vld [vmem:[#allocation2 + $0x8] sm:$0xff] }
 0x20b   : > { %v474_v51 = vadd.f32 %v472_v50, %v470_v48 }
 0x20c   : > { %v469_v46 = vld [vmem:[#allocation2] sm:$0xff] }
 0x20d   : > { %v473_v49 = vadd.f32 %v471_v47, %v469_v46  ;;  %v476_v53 = vmax.f32 %v474_v51, 0.0 }
 0x20f   : > { %v475_v52 = vmax.f32 %v473_v49, 0.0  ;;  %478 = vst [vmem:[%s1162_s8 + $0x8] sm:$0xff] %v476_v53 }
 0x211   : > { %477 = vst [vmem:[%s1162_s8] sm:$0xff] %v475_v52 }
 0x212 PF: > { %s1281_s21 = sld [smem:[#allocation13_spill]]  ;;  %s493_s6 = sshll.u32 %s1162_s8, 4  ;;  %s1187_s6 = int_to_ptr.vmem [resolvable:$true] %s493_s6 }
 0x213   : > { %s1282_s5 = sld [smem:[#allocation14_spill]]  ;;  %s1191_s13 = scalar_lea.sflag [#allocation5], %s257_s3 }
 0x214   : > { %s1283_s10 = sld [smem:[#allocation19_spill]]  ;;  %s843_s27 = scalar_lea.vmem %s1187_s6, 256 }
 0x215   : > { %p844_p2 = scmp.ne.s32.totalorder %s1187_s6, %s843_s27  ;;  %s974_s11 = smov [#allocation8]  }
 0x216   : > { %s847_s29 = sshll.u32 %s974_s11, 4  ;;  %s848_s29 = int_to_ptr.vmem [resolvable:$false] %s847_s29 }
 0x217   : > { %s849_s28 = scalar_lea.vmem %s848_s29, 512  ;;  %p850_p8 = scmp.lt.s32.totalorder %s1187_s6, %s848_s29 }
 0x218   : > { %s627_s22 = sshll.u32 %s1281_s21, 8  ;;  %p851_p6 = scmp.lt.s32.totalorder %s849_s28, %s843_s27 }
 0x219   : > { %p1284_p3 = scmp.ne.s32.totalorder %s1282_s5, 0 }
 0x21a   : > { %s1184_s4 = scalar_lea.hbm %s1283_s10, %s627_s22  ;;  %p852_p9 = por %p851_p6, %p850_p8 }
 0x21b   : > { %p845_p5 = pnand %p844_p2, %p1284_p3 }
 0x21d   : > { %p846_p7 = pneg %p845_p5 }
 0x21f   : > { %p853_p10 = pnand %p852_p9, %p846_p7 }
 0x221   : > { %856 = shalt.err (!%p853_p10)
}
 0x222   : > { %s857_s3 = scalar_lea.hbm %s1184_s4, 256  ;;  %s861_s15 = scalar_lea.hbm %s1283_s10, 512 }
 0x223   : > { %p858_p12 = scmp.ne.s32.totalorder %s1184_s4, %s857_s3  ;;  %p862_p11 = scmp.lt.s32.totalorder %s1184_s4, %s1283_s10 }
 0x224   : > { %p863_p4 = scmp.lt.s32.totalorder %s861_s15, %s857_s3 }
 0x225   : > { %p859_p13 = pnand %p858_p12, %p1284_p3 }
 0x226   : > { %p864_p1 = por %p863_p4, %p862_p11 }
 0x227   : > { %p860_p0 = pneg %p859_p13 }
 0x229   : > { %p865_p2 = pnand %p864_p1, %p860_p0 }
 0x22b   : > { %868 = shalt.err (!%p865_p2)
}
 0x22c   : > { %s975_s22 = smov 128   ;;  %s976_s7 = smov 8  }
 0x22d   : > { %677 = dma.vmem_to_hbm [thread:$0]  (%p1284_p3), %s1187_s6, 256, %s1184_s4, %s1191_s13, %s975_s22, %s975_s22, %s976_s7  }
 0x22e PF: > { %s1285_s9 = sld [smem:[#allocation12_spill]]  ;;  %p694_p5 = scmp.ge.s32.totalorder %s967_s25, 2 }
 0x22f   : > { %s1286_s27 = sld [smem:[#allocation15_spill]] }
 0x234   : > { %s508_s11 = sand.u32 1, %s1285_s9  }
 0x235   : > { %p1287_p7 = scmp.ne.s32.totalorder %s1286_s27, 0  ;;  %s509_s29 = scalar_lea.sflag [#allocation5], %s508_s11 }
 0x237   : > { %p688_p8 = pnand %p694_p5, %p1287_p7 }
 0x239   : > { %p689_p6 = pneg %p688_p8 }
 0x23b   : > { %922 = dma.done.wait (%p689_p6), %s509_s29, 256  }
 0x23c   : > { %924 = vsyncadd (%p689_p6), %s509_s29, 4294967040  ;;  %s21_s25 = sadd.s32 1, %s967_s25   ;;  %s1288_s5 = sld [smem:[#allocation16_spill]] }
 0x23d   : > { %p18_p9 = scmp.ge.s32.totalorder %s21_s25, 6   ;;  %s1289_s4 = smov %s1305_s18 }
 0x23e   : > { %s1290_s15 = smov %s931_s16  ;;  %s1291_s16 = smov %s935_s17 }
 0x23f   : > { %s1292_s17 = smov %s1117_s2  ;;  %s1293_s18 = smov %s943_s19 }
 0x240   : > { %s1294_s19 = smov %s947_s20  ;;  %s1295_s20 = smov %s1120_s14 }
 0x241   : > { %s1296_s21 = smov %s959_s23  ;;  %s1297_s22 = smov %s963_s24 }
 0x242   : > { %s1298_s23 = smov %s1288_s5  ;;  %s1299_s24 = smov %s1289_s4 }
 0x243   :  { %20 = sbr.rel (!%p18_p9) target bundleno = 14 (0xe), region = 96 }
 0x248   :  { %514 = vsyncpa [#allocation4], 1 }
 0x249   :  { %516 = vsyncpa [#allocation4 + $0x1], 1 }
 0x24a   :  { %517 = vsyncpa [#allocation7], 1 }
 0x24b   :  { %518 = vsyncpa [#allocation5], 1 }
 0x24c   :  { %520 = vsyncpa [#allocation5 + $0x1], 1 }

// kernel: tpu_custom_call.1
= control target key start
LH: loop header
LB: loop body
LE: loop exit
PB: predicated region body
PF: predicated region fallthrough
CT: control target
= control target key end

     0   :  { %s1251_s0 = inlined_call_operand.hbm [shape: f32[2,16,256], index: 0, kind: input, shape index: {}]   ;;  %s1252_s1 = inlined_call_operand.vmem [shape: f32[2,16,8], index: 1, kind: input, shape index: {}]   ;;  %s1253_s2 = inlined_call_operand.hbm [shape: f32[256,128], index: 2, kind: input, shape index: {}]   ;;  %s1254_s3 = inlined_call_operand.vmem [shape: f32[16,128], index: 3, kind: input, shape index: {}]   ;;  %s1255_s4 = inlined_call_operand.hbm [shape: f32[2,16,128], index: 4, kind: output, shape index: {}]  }
   0x1   :  { %1264 = sst [smem:[#allocation17_spill]] %s1253_s2 }
   0x2   :  { %1265 = sst [smem:[#allocation18_spill]] %s1254_s3 }
   0x3   :  { %1266 = sst [smem:[#allocation19_spill]] %s1255_s4 }
   0x4   :  { %9 = vsyncpa [#allocation4], 0 }
   0x5   :  { %11 = vsyncpa [#allocation4 + $0x1], 0 }
   0x6   :  { %12 = vsyncpa [#allocation7], 0 }
   0x7   :  { %13 = vsyncpa [#allocation5], 0 }
   0x8   :  { %15 = vsyncpa [#allocation5 + $0x1], 0  ;;  %s1002_s15 = smov 0   ;;  %s1004_s16 = smov 0  }
   0x9   :  { %s1006_s17 = smov 0   ;;  %s1008_s18 = smov 0  }
   0xa   :  { %s1010_s19 = smov 0   ;;  %s1012_s20 = smov 0  }
   0xb   :  { %s1014_s21 = smov 0   ;;  %s1016_s22 = smov 0  }
   0xc   :  { %s1018_s23 = smov 0   ;;  %s1020_s24 = smov 0  }
   0xd   :  { %s1022_s25 = smov 0  }
   0xe LB: > { %1267 = sst [smem:[#allocation12_spill]] %s927_s15  ;;  %s602_s26 = sadd.s32 4294967295, %s967_s25   ;;  %s967_s25 = sphi %s1022_s25, %s21_s25   ;;  %s963_s24 = sphi %s1020_s24, %s1299_s24   ;;  %s959_s23 = sphi %s1018_s23, %s1298_s23   ;;  %s955_s22 = sphi %s1016_s22, %s1297_s22   ;;  %s951_s21 = sphi %s1014_s21, %s1296_s21   ;;  %s947_s20 = sphi %s1012_s20, %s1295_s20   ;;  %s943_s19 = sphi %s1010_s19, %s1294_s19   ;;  %s939_s18 = sphi %s1008_s18, %s1293_s18   ;;  %s935_s17 = sphi %s1006_s17, %s1292_s17   ;;  %s931_s16 = sphi %s1004_s16, %s1291_s16   ;;  %s927_s15 = sphi %s1002_s15, %s1290_s15  }
   0xf   : > { %1268 = sst [smem:[#allocation13_spill]] %s955_s22  ;;  %s603_s27 = sadd.s32 4294967294, %s967_s25  }
  0x10   : > { %p55_p0 = scmp.ne.s32.totalorder %s943_s19, %s939_s18  ;;  %p1058_p1 = scmp.eq.s32.totalorder %s602_s26, 0 }
  0x11   : > { %p146_p2 = scmp.ne.s32.totalorder %s935_s17, %s931_s16  ;;  %p147_p3 = scmp.eq.s32.totalorder %s602_s26, 3 }
  0x12   : > { %p1066_p4 = por %p1058_p1, %p55_p0  ;;  %p152_p5 = scmp.ne.s32.totalorder %s931_s16, %s927_s15 }
  0x13   : > { %p1072_p6 = por %p147_p3, %p146_p2  ;;  %p153_p7 = scmp.eq.s32.totalorder %s603_s27, 3 }
  0x14   : > { %p604_p8 = scmp.ge.s32.totalorder %s967_s25, 1  ;;  %p160_p9 = scmp.lt.s32.totalorder %s967_s25, 5 }
  0x15   : > { %s1271_s30 = scalar_select %p1072_p6, 1, 0 }
  0x16   : > { %p1078_p10 = por %p153_p7, %p152_p5  ;;  %p1082_p11 = pnand %p604_p8, %p160_p9 }
  0x17   : > { %1272 = sst [smem:[#allocation14_spill]] %s1271_s30  ;;  %s969_s7 = smov [#allocation6]  }
  0x18   : > { %s1273_s5 = scalar_select %p1078_p10, 1, 0 }
  0x19   : > { %s172_s8 = sshll.u32 %s969_s7, 4  ;;  %p679_p12 = pneg %p1082_p11  ;;  %s173_s8 = int_to_ptr.vmem [resolvable:$true] %s172_s8 }
  0x1a   : > { %1274 = sst [smem:[#allocation15_spill]] %s1273_s5  ;;  %s800_s9 = scalar_lea.vmem %s173_s8, 4096 }
  0x1b   : > { %p680_p13 = pnand %p679_p12, %p1058_p1  ;;  %p801_p2 = scmp.ne.s32.totalorder %s173_s8, %s800_s9 }
  0x1c   : > { %p808_p7 = scmp.lt.s32.totalorder %s173_s8, %s173_s8  ;;  %p809_p6 = scmp.lt.s32.totalorder %s800_s9, %s800_s9 }
  0x1d   : > { %p791_p0 = pneg %p680_p13 }
  0x1e   : > { %p810_p10 = por %p809_p6, %p808_p7 }
  0x1f   : > { %p803_p3 = pnand %p801_p2, %p791_p0 }
  0x21   : > { %p804_p5 = pneg %p803_p3 }
  0x23   : > { %p811_p8 = pnand %p810_p10, %p804_p5 }
  0x25   : > { %814 = shalt.err (!%p811_p8)
}
  0x26   : > { %s970_s10 = smov 128   ;;  %s971_s11 = smov 8  }
  0x27   : > { %s1276_s2 = sld [smem:[#allocation17_spill]]  ;;  %s30_s14 = sadd.s32 1, %s959_s23 }
  0x28   : > { %s33_s18 = sadd.s32 1, %s963_s24  ;;  %p31_p6 = scmp.ge.s32.totalorder %s30_s14, 2 }
  0x29   : > { %s42_s26 = sadd.s32 1, %s947_s20  ;;  %p49_p9 = scmp.ne.s32.totalorder %s947_s20, %s943_s19 }
  0x2a   : > { %p50_p10 = scmp.eq.s32.totalorder %s967_s25, 0  ;;  %s1301_s14 = smov (%p31_p6, %s30_s14), 0 }
  0x2b   : > { %1277 = sst [smem:[#allocation16_spill]] %s1301_s14  ;;  %s1303_s18 = smov (!%p31_p6, %s33_s18), %s963_s24 }
  0x2c   : > { %s38_s27 = ssub.s32 %s959_s23, %s1301_s14  ;;  %p1104_p12 = por %p50_p10, %p49_p9 }
  0x2d   : > { %682 = dma.hbm_to_vmem [thread:$0]  (!%p680_p13), %s1276_s2, 4096, %s173_s8, [#allocation7], %s970_s10, %s970_s10, %s971_s11  }
  0x2e   : > { %p35_p13 = scmp.ge.s32.totalorder %s1303_s18, 2  ;;  %s136_s8 = sadd.s32 1, %s935_s17 }
  0x2f   : > { %p692_p0 = scmp.lt.s32.totalorder %s967_s25, 4  ;;  %s189_s9 = sand.u32 1, %s947_s20  }
  0x30   : > { %s1305_s18 = smov (%p35_p13, %s1303_s18), 0  ;;  %s607_s10 = sshll.u32 %s189_s9, 4 }
  0x31   : > { %s37_s11 = ssub.s32 %s963_s24, %s1305_s18  ;;  %s608_s13 = sshll.u32 %s959_s23, 1 }
  0x32   : > { %s39_s12 = sor.u32 %s38_s27, %s37_s11  ;;  %p134_p2 = scmp.eq.s32.totalorder %s37_s11, 0 }
  0x33   : > { %p40_p3 = scmp.eq.s32.totalorder %s39_s12, 0  ;;  %s609_s5 = sshll.u32 %s963_s24, 2 }
  0x34   : > { %s1117_s2 = scalar_select %p134_p2, %s935_s17, %s136_s8  }
  0x35   : > { %s1120_s14 = scalar_select %p40_p3, %s947_s20, %s42_s26  }
  0x36   : > { %s193_s15 = scalar_lea.vmem [#allocation3], %s607_s10  ;;  %s199_s30 = sadd.s32 %s609_s5, %s608_s13 }
  0x37   : > { %s203_s4 = sshll.u32 %s193_s15, 4  ;;  %s610_s22 = sshll.u32 %s199_s30, 7  ;;  %s204_s4 = int_to_ptr.vmem [resolvable:$true] %s203_s4 }
  0x38   : > { %p1127_p5 = pnand %p692_p0, %p1104_p12  ;;  %s201_s8 = scalar_lea.hbm %s1251_s0, %s610_s22 }
  0x39   : > { %s190_s12 = scalar_lea.sflag [#allocation4], %s189_s9  ;;  %s828_s26 = scalar_lea.vmem %s204_s4, 256 }
  0x3a   : > { %p817_p7 = pneg %p1127_p5  ;;  %p829_p8 = scmp.ne.s32.totalorder %s204_s4, %s828_s26 }
  0x3b   : > { %s972_s15 = smov [#allocation3]  }
  0x3c   : > { %p831_p6 = pnand %p829_p8, %p817_p7  ;;  %s833_s30 = sshll.u32 %s972_s15, 4  ;;  %s834_s30 = int_to_ptr.vmem [resolvable:$false] %s833_s30 }
  0x3d   : > { %s835_s5 = scalar_lea.vmem %s834_s30, 512  ;;  %p836_p10 = scmp.lt.s32.totalorder %s204_s4, %s834_s30 }
  0x3e   : > { %p832_p9 = pneg %p831_p6  ;;  %p837_p12 = scmp.lt.s32.totalorder %s835_s5, %s828_s26 }
  0x40   : > { %p838_p13 = por %p837_p12, %p836_p10 }
  0x42   : > { %p839_p0 = pnand %p838_p13, %p832_p9 }
  0x44   : > { %842 = shalt.err (!%p839_p0)
}
  0x45   : > { %686 = dma.hbm_to_vmem [thread:$0]  (!%p1127_p5), %s201_s8, 256, %s204_s4, %s190_s12  }
  0x46   : > { %220 = sbr.rel (%p1082_p11) target bundleno = 558 (0x22e), region = 36  ;;  %s222_s22 = sand.u32 (!%p1082_p11), 1, %s943_s19  }
  0x47   : > { %s1141_s7 = sshll.u32 (!%p1082_p11), %s222_s22, 4  ;;  %s223_s9 = scalar_lea.sflag (!%p1082_p11), [#allocation4], %s222_s22 }
  0x48   : > { %s226_s10 = scalar_lea.vmem (!%p1082_p11), [#allocation3], %s1141_s7 }
  0x4b   : > { %914 = dma.done.wait (%p1066_p4), %s223_s9, 256  }
  0x4c   : > { %916 = vsyncadd (%p1066_p4), %s223_s9, 4294967040 }
  0x4d   : > { %918 = dma.done.wait (%p1058_p1), [#allocation7], 4096  }
  0x4e   : > { %920 = vsyncadd (%p1058_p1), [#allocation7], 4294963200  ;;  %s257_s3 = sand.u32 1, %s931_s16   ;;  %p260_p11 = scmp.lt.s32.totalorder %s951_s21, 1 }
  0x4f   : > { %s614_s4 = sshll.u32 %s257_s3, 4  ;;  %p617_p4 = scmp.ne.s32.totalorder %s951_s21, 0 }
  0x50   : > { %s261_s6 = scalar_select %p260_p11, %s951_s21, 1 }
  0x51   : > { %s1162_s8 = scalar_lea.vmem [#allocation8], %s614_s4  ;;  %268 = sbr.rel (%p617_p4) target bundleno = 88 (0x58), region = 48 }
  0x52   : > { %s626_s13 = sshll.u32 %s261_s6, 4 }
  0x53   : > { %s1160_s29 = scalar_lea.vmem %s1252_s1, %s626_s13 }
  0x56   : > { %v973_v0 = vmov 0.0  }
  0x57   : > { %269 = vst [vmem:[#allocation2] sm:$0xff] %v973_v0  ;;  %270 = vst [vmem:[#allocation2 + $0x8] sm:$0xff] %v973_v0 }
  0x58 PF: > { %v304_v1 = vld [vmem:[#allocation6 + $0xf8] sm:$0xff]  ;;  %v303_v3 = vld [vmem:[#allocation6 + $0xf0] sm:$0xff]  ;;  %v302_v5 = vld [vmem:[#allocation6 + $0xe8] sm:$0xff]  ;;  %vm379_vm0 = vcmask 64512   ;;  %p620_p1 = scmp.ne.s32.totalorder %s951_s21, 1 }
  0x59   : > { %v288_v2 = vld [vmem:[#allocation6 + $0x78] sm:$0xff]  ;;  %628 = vmatprep.subr.mxu0 %v304_v1  ;;  %v287_v4 = vld [vmem:[#allocation6 + $0x70] sm:$0xff]  ;;  %v286_v6 = vld [vmem:[#allocation6 + $0x68] sm:$0xff]  ;;  %s1280_s26 = sld [smem:[#allocation18_spill]] (!%p620_p1) }
  0x5a   : > { %629 = vmatpush3.msra.mxu0 %v288_v2  ;;  %v301_v7 = vld [vmem:[#allocation6 + $0xe0] sm:$0xff]  ;;  %v300_v9 = vld [vmem:[#allocation6 + $0xd8] sm:$0xff]  ;;  %v299_v11 = vld [vmem:[#allocation6 + $0xd0] sm:$0xff] }
  0x5b   : > { %630 = vmatprep.subr.mxu0 %v303_v3  ;;  %v285_v8 = vld [vmem:[#allocation6 + $0x60] sm:$0xff]  ;;  %v284_v10 = vld [vmem:[#allocation6 + $0x58] sm:$0xff]  ;;  %v283_v12 = vld [vmem:[#allocation6 + $0x50] sm:$0xff] }
  0x5c   : > { %631 = vmatpush3.msra.mxu0 %v287_v4  ;;  %v298_v13 = vld [vmem:[#allocation6 + $0xc8] sm:$0xff]  ;;  %v297_v16 = vld [vmem:[#allocation6 + $0xc0] sm:$0xff]  ;;  %v296_v18 = vld [vmem:[#allocation6 + $0xb8] sm:$0xff] }
  0x5d   : > { %632 = vmatprep.subr.mxu0 %v302_v5  ;;  %v272_v14 = vld [vmem:[%s226_s10 + $0x8] sm:$0xff]  ;;  %v281_v17 = vld [vmem:[#allocation6 + $0x40] sm:$0xff]  ;;  %v295_v20 = vld [vmem:[#allocation6 + $0xb0] sm:$0xff] }
  0x5e   : > { %633 = vmatpush3.msra.mxu0 %v286_v6  ;;  %v282_v15 = vld [vmem:[#allocation6 + $0x48] sm:$0xff]  ;;  %369 = vmatprep.mubr.f32.mxu0 %v272_v14  ;;  %v280_v19 = vld [vmem:[#allocation6 + $0x38] sm:$0xff]  ;;  %v279_v21 = vld [vmem:[#allocation6 + $0x30] sm:$0xff] }
  0x5f   : > { %634 = vmatprep.subr.mxu0 %v301_v7  ;;  %v294_v22 = vld [vmem:[#allocation6 + $0xa8] sm:$0xff]  ;;  %v293_v24 = vld [vmem:[#allocation6 + $0xa0] sm:$0xff]  ;;  %v292_v26 = vld [vmem:[#allocation6 + $0x98] sm:$0xff] }
  0x60   : > { %635 = vmatpush3.msra.mxu0 %v285_v8  ;;  %v278_v23 = vld [vmem:[#allocation6 + $0x28] sm:$0xff]  ;;  %v277_v25 = vld [vmem:[#allocation6 + $0x20] sm:$0xff]  ;;  %v276_v27 = vld [vmem:[#allocation6 + $0x18] sm:$0xff] }
  0x61   : > { %636 = vmatprep.subr.mxu0 %v300_v9  ;;  %v291_v28 = vld [vmem:[#allocation6 + $0x90] sm:$0xff]  ;;  %v290_v30 = vld [vmem:[#allocation6 + $0x88] sm:$0xff]  ;;  %v289_v32 = vld [vmem:[#allocation6 + $0x80] sm:$0xff] }
  0x62   : > { %637 = vmatpush3.msra.mxu0 %v284_v10  ;;  %v275_v29 = vld [vmem:[#allocation6 + $0x10] sm:$0xff]  ;;  %v274_v31 = vld [vmem:[#allocation6 + $0x8] sm:$0xff]  ;;  %v273_v33 = vld [vmem:[#allocation6] sm:$0xff] }
  0x63   : > { %638 = vmatprep.subr.mxu0 %v299_v11  ;;  %v271_v34 = vld [vmem:[%s226_s10] sm:$0xff]  ;;  %v378_v39 = vld [vmem:[%s1160_s29 + $0x8] sm:$0xff] }
  0x64   : > { %639 = vmatpush3.msra.mxu0 %v283_v12  ;;  %v377_v35 = vld [vmem:[%s1160_s29] sm:$0xff]  ;;  %v376_v40 = vld [vmem:[#allocation2 + $0x8] sm:$0xff] }
  0x65   : > { %640 = vmatprep.subr.mxu0 %v298_v13  ;;  %668 = vmatprep.mubr.msk.f32.mxu1 %vm379_vm0, %v377_v35  ;;  %v375_v42 = vld [vmem:[#allocation2] sm:$0xff] }
  0x66   : > { %641 = vmatpush3.msra.mxu0 %v282_v15 }
  0x67   : > { %642 = vmatprep.subr.mxu0 %v297_v16 }
  0x68   : > { %643 = vmatpush3.msra.mxu0 %v281_v17 }
  0x69   : > { %644 = vmatprep.subr.mxu0 %v296_v18 }
  0x6a   : > { %645 = vmatpush3.msra.mxu0 %v280_v19 }
  0x6b   : > { %646 = vmatprep.subr.mxu0 %v295_v20 }
  0x6c   : > { %647 = vmatpush3.msra.mxu0 %v279_v21 }
  0x6d   : > { %648 = vmatprep.subr.mxu0 %v294_v22 }
  0x6e   : > { %649 = vmatpush3.msra.mxu0 %v278_v23 }
  0x6f   : > { %650 = vmatprep.subr.mxu0 %v293_v24 }
  0x70   : > { %651 = vmatpush3.msra.mxu0 %v277_v25 }
  0x71   : > { %652 = vmatprep.subr.mxu0 %v292_v26 }
  0x72   : > { %653 = vmatpush3.msra.mxu0 %v276_v27 }
  0x73   : > { %654 = vmatprep.subr.mxu0 %v291_v28 }
  0x74   : > { %655 = vmatpush3.msra.mxu0 %v275_v29 }
  0x75   : > { %656 = vmatprep.subr.mxu0 %v290_v30 }
  0x76   : > { %657 = vmatpush3.msra.mxu0 %v274_v31 }
  0x77   : > { %658 = vmatprep.subr.mxu0 %v289_v32 }
  0x78   : > { %659 = vmatpush3.msra.mxu0 %v273_v33 }
  0x79   : > { %370 = vmatmul.mubr.f32.vlgmr.msra.gmra.mxu0 %v271_v34 }
 0x139   : > { %v660_v36 = vpop.f32.mrf.mxu0 }
 0x13b   : > { %v661_v37 = vpop.f32.mrf.mxu0 }
 0x13c   : > { %v662_v38 = vadd.f32 %v661_v37, %v660_v36 }
 0x13e   : > { %666 = vmatprep.subr.mxu1 %v662_v38 }
 0x13f   : > { %667 = vmatpush3.msra.mxu1 %v662_v38 }
 0x140   : > { %669 = vmatmul.mubr.msk.f32.vlgmr.msra.gmra.mxu1 %vm379_vm0, %v378_v39 }
 0x200   : > { %v670_v41 = vpop.f32.mrf.mxu1 }
 0x201   : > { %v462_v43 = vadd.f32 %v670_v41, %v376_v40  ;;  %468 = sbr.rel (%p620_p1) target bundleno = 530 (0x212), region = 52 }
 0x202   : > { %v452_v44 = vpop.f32.mrf.mxu1 }
 0x203   : > { %464 = vst [vmem:[#allocation2 + $0x8] sm:$0xff] %v462_v43  ;;  %v461_v45 = vadd.f32 %v452_v44, %v375_v42 }
 0x205   : > { %463 = vst [vmem:[#allocation2] sm:$0xff] %v461_v45 }
 0x206   : > { %v471_v47 = vld [vmem:[%s1280_s26] sm:$0xff]  ;;  %v472_v50 = vld [vmem:[%s1280_s26 + $0x8] sm:$0xff] }
 0x20a   : > { %v470_v48 = vld [vmem:[#allocation2 + $0x8] sm:$0xff] }
 0x20b   : > { %v474_v51 = vadd.f32 %v472_v50, %v470_v48 }
 0x20c   : > { %v469_v46 = vld [vmem:[#allocation2] sm:$0xff] }
 0x20d   : > { %v473_v49 = vadd.f32 %v471_v47, %v469_v46  ;;  %v476_v53 = vmax.f32 %v474_v51, 0.0 }
 0x20f   : > { %v475_v52 = vmax.f32 %v473_v49, 0.0  ;;  %478 = vst [vmem:[%s1162_s8 + $0x8] sm:$0xff] %v476_v53 }
 0x211   : > { %477 = vst [vmem:[%s1162_s8] sm:$0xff] %v475_v52 }
 0x212 PF: > { %s1281_s21 = sld [smem:[#allocation13_spill]]  ;;  %s493_s6 = sshll.u32 %s1162_s8, 4  ;;  %s1187_s6 = int_to_ptr.vmem [resolvable:$true] %s493_s6 }
 0x213   : > { %s1282_s5 = sld [smem:[#allocation14_spill]]  ;;  %s1191_s13 = scalar_lea.sflag [#allocation5], %s257_s3 }
 0x214   : > { %s1283_s10 = sld [smem:[#allocation19_spill]]  ;;  %s843_s27 = scalar_lea.vmem %s1187_s6, 256 }
 0x215   : > { %p844_p2 = scmp.ne.s32.totalorder %s1187_s6, %s843_s27  ;;  %s974_s11 = smov [#allocation8]  }
 0x216   : > { %s847_s29 = sshll.u32 %s974_s11, 4  ;;  %s848_s29 = int_to_ptr.vmem [resolvable:$false] %s847_s29 }
 0x217   : > { %s849_s28 = scalar_lea.vmem %s848_s29, 512  ;;  %p850_p8 = scmp.lt.s32.totalorder %s1187_s6, %s848_s29 }
 0x218   : > { %s627_s22 = sshll.u32 %s1281_s21, 8  ;;  %p851_p6 = scmp.lt.s32.totalorder %s849_s28, %s843_s27 }
 0x219   : > { %p1284_p3 = scmp.ne.s32.totalorder %s1282_s5, 0 }
 0x21a   : > { %s1184_s4 = scalar_lea.hbm %s1283_s10, %s627_s22  ;;  %p852_p9 = por %p851_p6, %p850_p8 }
 0x21b   : > { %p845_p5 = pnand %p844_p2, %p1284_p3 }
 0x21d   : > { %p846_p7 = pneg %p845_p5 }
 0x21f   : > { %p853_p10 = pnand %p852_p9, %p846_p7 }
 0x221   : > { %856 = shalt.err (!%p853_p10)
}
 0x222   : > { %s857_s3 = scalar_lea.hbm %s1184_s4, 256  ;;  %s861_s15 = scalar_lea.hbm %s1283_s10, 512 }
 0x223   : > { %p858_p12 = scmp.ne.s32.totalorder %s1184_s4, %s857_s3  ;;  %p862_p11 = scmp.lt.s32.totalorder %s1184_s4, %s1283_s10 }
 0x224   : > { %p863_p4 = scmp.lt.s32.totalorder %s861_s15, %s857_s3 }
 0x225   : > { %p859_p13 = pnand %p858_p12, %p1284_p3 }
 0x226   : > { %p864_p1 = por %p863_p4, %p862_p11 }
 0x227   : > { %p860_p0 = pneg %p859_p13 }
 0x229   : > { %p865_p2 = pnand %p864_p1, %p860_p0 }
 0x22b   : > { %868 = shalt.err (!%p865_p2)
}
 0x22c   : > { %s975_s22 = smov 128   ;;  %s976_s7 = smov 8  }
 0x22d   : > { %677 = dma.vmem_to_hbm [thread:$0]  (%p1284_p3), %s1187_s6, 256, %s1184_s4, %s1191_s13, %s975_s22, %s975_s22, %s976_s7  }
 0x22e PF: > { %s1285_s9 = sld [smem:[#allocation12_spill]]  ;;  %p694_p5 = scmp.ge.s32.totalorder %s967_s25, 2 }
 0x22f   : > { %s1286_s27 = sld [smem:[#allocation15_spill]] }
 0x234   : > { %s508_s11 = sand.u32 1, %s1285_s9  }
 0x235   : > { %p1287_p7 = scmp.ne.s32.totalorder %s1286_s27, 0  ;;  %s509_s29 = scalar_lea.sflag [#allocation5], %s508_s11 }
 0x237   : > { %p688_p8 = pnand %p694_p5, %p1287_p7 }
 0x239   : > { %p689_p6 = pneg %p688_p8 }
 0x23b   : > { %922 = dma.done.wait (%p689_p6), %s509_s29, 256  }
 0x23c   : > { %924 = vsyncadd (%p689_p6), %s509_s29, 4294967040  ;;  %s21_s25 = sadd.s32 1, %s967_s25   ;;  %s1288_s5 = sld [smem:[#allocation16_spill]] }
 0x23d   : > { %p18_p9 = scmp.ge.s32.totalorder %s21_s25, 6   ;;  %s1289_s4 = smov %s1305_s18 }
 0x23e   : > { %s1290_s15 = smov %s931_s16  ;;  %s1291_s16 = smov %s935_s17 }
 0x23f   : > { %s1292_s17 = smov %s1117_s2  ;;  %s1293_s18 = smov %s943_s19 }
 0x240   : > { %s1294_s19 = smov %s947_s20  ;;  %s1295_s20 = smov %s1120_s14 }
 0x241   : > { %s1296_s21 = smov %s959_s23  ;;  %s1297_s22 = smov %s963_s24 }
 0x242   : > { %s1298_s23 = smov %s1288_s5  ;;  %s1299_s24 = smov %s1289_s4 }
 0x243   :  { %20 = sbr.rel (!%p18_p9) target bundleno = 14 (0xe), region = 96 }
 0x248   :  { %514 = vsyncpa [#allocation4], 1 }
 0x249   :  { %516 = vsyncpa [#allocation4 + $0x1], 1 }
 0x24a   :  { %517 = vsyncpa [#allocation7], 1 }
 0x24b   :  { %518 = vsyncpa [#allocation5], 1 }
 0x24c   :  { %520 = vsyncpa [#allocation5 + $0x1], 1 }

</bundles_post_ra>
